<compile_context>
chip_gen: v7x
topology: tpu7x:2x2x1
jax: 0.10.0
libtpu: 0.0.40
codegen_flags: <defaults>
</compile_context>

<pallas_src>
import functools

import jax
import jax.numpy as jnp
from jax.experimental import pallas as pl
from jax.experimental.pallas import tpu as pltpu


def _round_up(x, m):
    return ((x + m - 1) // m) * m


def _location_kernel(x_ref, w_ref, o_ref, acc_ref, *, gt, n_shift):
    """One (batch, time-tile) grid step.

    x_ref  : [1, R_halo, 16]  padded activation, 16 = 8 time steps x 2 channels
    w_ref  : [16*n_shift, 8*D] fused (conv ∘ dense) weight, expanded per row phase
    o_ref  : [1, gt, 8*D]     packed output (8 time steps per row, lane-dense)
    acc_ref: [gt, 8*D] f32    accumulator scratch
    """
    j = pl.program_id(1)
    g0 = pl.multiple_of(j * gt, gt)
    for m in range(n_shift):                      # static, fully unrolled (5 taps)
        xm = x_ref[0, pl.ds(g0 + m, gt), :]       # (gt, 16)
        part = jnp.dot(xm, w_ref[16 * m:16 * (m + 1), :],
                       preferred_element_type=jnp.float32)   # (gt, 8*D)
        if m == 0:
            acc_ref[...] = part
        else:
            acc_ref[...] += part
    o_ref[0] = acc_ref[...].astype(o_ref.dtype)


def location_layer(attention_cat, conv_w, dense_w):
    """Pallas LocationLayer forward.

    attention_cat: [B, 2, T]   (PyTorch NCL layout)
    conv_w       : [F, 2, K]   (PyTorch Conv1d weight layout)
    dense_w      : [D, F]      (PyTorch Linear weight layout)
    returns      : [B, T, D]
    """
    B, C_in, T = attention_cat.shape
    assert C_in == 2, "LocationLayer expects 2 input channels"
    F_, _, K = conv_w.shape
    D = dense_w.shape[0]
    pad_left = (K - 1) // 2
    dtype = attention_cat.dtype

    # ---- fused (conv ∘ dense) weight, expanded over the 8 row phases --------
    # Wf[2k + c, d] = sum_f conv_w[f, c, k] * dense_w[d, f]
    wf = jnp.einsum("fck,df->kcd",
                    conv_w.astype(jnp.float32),
                    dense_w.astype(jnp.float32)).reshape(2 * K, D)
    n_shift = -(-(2 * K + 14) // 16)          # 16-wide rows spanned by a window group
    P = 16 * n_shift                          # = 80 for K=31
    w_big = jnp.zeros((P, 8 * D), jnp.float32)
    for r in range(8):                        # W_big[p, r*D + d] = Wf[p - 2r, d]
        w_big = w_big.at[2 * r:2 * r + 2 * K, r * D:(r + 1) * D].set(wf)
    w_big = w_big.astype(dtype)

    # ---- tile sizes ----------------------------------------------------------
    TT = min(2048, _round_up(T, 64))          # output rows per grid step
    NT = -(-T // TT)
    if B * NT < 2 and TT % 128 == 0:          # >=2 grid steps when possible (v7x: 2 TCs)
        TT //= 2
        NT = -(-T // TT)
    T_pad = NT * TT
    GT = TT // 8                              # packed output rows per step (mult of 8)

    # ---- padded, (time, channel)-interleaved activation ---------------------
    halo_t = T_pad + 8 * (n_shift - 1)        # padded time extent (covers conv halo)
    x_nlc = jnp.transpose(attention_cat, (0, 2, 1))                      # [B, T, 2]
    x_halo = jnp.pad(x_nlc, ((0, 0), (pad_left, halo_t - pad_left - T), (0, 0)))
    R_halo = (2 * halo_t) // 16               # = T_pad // 8 + n_shift - 1
    x16 = x_halo.reshape(B, R_halo, 16).astype(dtype)

    kernel = functools.partial(_location_kernel, gt=GT, n_shift=n_shift)

    out = pl.pallas_call(
        kernel,
        out_shape=jax.ShapeDtypeStruct((B, T_pad // 8, 8 * D), dtype),
        grid_spec=pltpu.PrefetchScalarGridSpec(
            num_scalar_prefetch=0,
            grid=(B, NT),
            in_specs=[
                # Whole (tiny) padded sequence of batch b stays resident; constant
                # block index across the time-tile axis -> no re-fetch per tile.
                pl.BlockSpec((1, R_halo, 16), lambda b, j: (b, 0, 0)),
                # Fused weight resident across all grid steps.
                pl.BlockSpec((P, 8 * D), lambda b, j: (0, 0)),
            ],
            out_specs=pl.BlockSpec((1, GT, 8 * D), lambda b, j: (b, j, 0)),
            scratch_shapes=[pltpu.VMEM((GT, 8 * D), jnp.float32)],
        ),
        compiler_params=pltpu.CompilerParams(
            dimension_semantics=("parallel", "parallel")),
    )(x16, w_big)

    # Pure row-major view back to [B, T, D]; padded rows sliced off.
    return out.reshape(B, T_pad, D)[:, :T, :]


def _reference(attention_cat, conv_w, dense_w):
    """Plain-JAX reference of the PyTorch forward (unfused, for verification)."""
    B, C_in, T = attention_cat.shape
    F_, _, K = conv_w.shape
    pad = (K - 1) // 2
    x_pad = jnp.pad(attention_cat, ((0, 0), (0, 0), (pad, pad)))   # [B, 2, T+K-1]
    # windows[b, c, t, k] = x_pad[b, c, t + k]
    windows = jnp.stack([x_pad[:, :, k:k + T] for k in range(K)], axis=-1)
    conv = jnp.einsum("bctk,fck->btf", windows, conv_w)            # [B, T, F]
    return jnp.einsum("btf,df->btd", conv, dense_w)                # [B, T, D]


if __name__ == "__main__":
    # Small shapes consistent with the module:
    #   attention_cat: [B=2, 2, T=8], n_filters=32, kernel=31, attention_dim=32
    B, T = 2, 8
    attention_dim = 32
    attention_n_filters = 32
    attention_kernel_size = 31

    key = jax.random.PRNGKey(0)
    k_x, k_conv, k_dense = jax.random.split(key, 3)

    attention_cat = jax.random.normal(k_x, (B, 2, T), dtype=jnp.float32)
    # Deterministic synthetic weights (shapes follow nn.Conv1d / Linear).
    conv_w = jax.random.normal(
        k_conv, (attention_n_filters, 2, attention_kernel_size), dtype=jnp.float32
    ) * 0.1
    dense_w = jax.random.normal(
        k_dense, (attention_dim, attention_n_filters), dtype=jnp.float32
    ) * 0.1  # TODO(synk): xavier_uniform(gain=tanh) init not reproduced bit-exactly

    out = location_layer(attention_cat, conv_w, dense_w)
    out = jax.block_until_ready(out)

    ref = _reference(attention_cat, conv_w, dense_w)
    assert out.shape == (B, T, attention_dim), out.shape
    # Weight fusion changes fp32 summation order; verify within tolerance.
    assert jnp.allclose(out, ref, atol=1e-4, rtol=1e-4), "mismatch vs reference"

    print("KERNEL_OK")
</pallas_src>

<mosaic_0001>
module attributes {stable_mosaic.version = 11 : i64} {
  func.func @_location_kernel(%arg0: i32, %arg1: i32, %arg2: memref<1x12x16xf32, #tpu.memory_space<vmem>>, %arg3: memref<80x256xf32, #tpu.memory_space<vmem>>, %arg4: memref<1x8x256xf32, #tpu.memory_space<vmem>>, %arg5: memref<8x256xf32, #tpu.memory_space<vmem>>) attributes {dimension_semantics = [#tpu.dimension_semantics<parallel>, #tpu.dimension_semantics<parallel>], iteration_bounds = array<i64: 2, 1>, scalar_prefetch = 0 : i64, scratch_operands = 1 : i64, tpu.core_type = #tpu.core_type<tc>, window_params = [{transform_indices = @transform_0, window_bounds = array<i64: 1, 12, 16>}, {pipeline_mode = #tpu.pipeline_mode<synchronous>, transform_indices = @transform_1, window_bounds = array<i64: 80, 256>}, {transform_indices = @transform_2, window_bounds = array<i64: 1, 8, 256>}]} {
    %c8_i32 = arith.constant 8 : i32
    %0 = arith.muli %arg1, %c8_i32 : i32
    %1 = tpu.assume_multiple %0, 8 : i32
    %c0_i32 = arith.constant 0 : i32
    %2 = arith.addi %1, %c0_i32 : i32
    %c0 = arith.constant 0 : index
    %3 = arith.index_cast %2 : i32 to index
    %c0_0 = arith.constant 0 : index
    %4 = vector.load %arg2[%c0, %3, %c0_0] : memref<1x12x16xf32, #tpu.memory_space<vmem>>, vector<1x8x16xf32>
    %5 = vector.shape_cast %4 : vector<1x8x16xf32> to vector<8x16xf32>
    %c0_1 = arith.constant 0 : index
    %c0_2 = arith.constant 0 : index
    %6 = vector.load %arg3[%c0_1, %c0_2] : memref<80x256xf32, #tpu.memory_space<vmem>>, vector<16x256xf32>
    %cst = arith.constant dense<0.000000e+00> : vector<8x256xf32>
    %7 = tpu.matmul %5, %6, %cst {dimension_numbers = #tpu.dot_dimension_numbers<[1], [0], [0], [1], [0, 0, 1, 1], [], []>} : vector<8x16xf32>, vector<16x256xf32>, vector<8x256xf32> -> vector<8x256xf32>
    %c0_3 = arith.constant 0 : index
    %c0_4 = arith.constant 0 : index
    %8 = vector.load %arg5[%c0_3, %c0_4] : memref<8x256xf32, #tpu.memory_space<vmem>>, vector<8x256xf32>
    tpu.vector_store %arg5[%c0_3, %c0_4], %7 {strides = array<i32>} : memref<8x256xf32, #tpu.memory_space<vmem>>, vector<8x256xf32>,
    %c1_i32 = arith.constant 1 : i32
    %9 = arith.addi %1, %c1_i32 : i32
    %c0_5 = arith.constant 0 : index
    %10 = arith.index_cast %9 : i32 to index
    %c0_6 = arith.constant 0 : index
    %11 = vector.load %arg2[%c0_5, %10, %c0_6] : memref<1x12x16xf32, #tpu.memory_space<vmem>>, vector<1x8x16xf32>
    %12 = vector.shape_cast %11 : vector<1x8x16xf32> to vector<8x16xf32>
    %c16 = arith.constant 16 : index
    %c0_7 = arith.constant 0 : index
    %13 = vector.load %arg3[%c16, %c0_7] : memref<80x256xf32, #tpu.memory_space<vmem>>, vector<16x256xf32>
    %cst_8 = arith.constant dense<0.000000e+00> : vector<8x256xf32>
    %14 = tpu.matmul %12, %13, %cst_8 {dimension_numbers = #tpu.dot_dimension_numbers<[1], [0], [0], [1], [0, 0, 1, 1], [], []>} : vector<8x16xf32>, vector<16x256xf32>, vector<8x256xf32> -> vector<8x256xf32>
    %c0_9 = arith.constant 0 : index
    %c0_10 = arith.constant 0 : index
    %15 = vector.load %arg5[%c0_9, %c0_10] : memref<8x256xf32, #tpu.memory_space<vmem>>, vector<8x256xf32>
    %16 = arith.addf %15, %14 : vector<8x256xf32>
    %c0_11 = arith.constant 0 : index
    %c0_12 = arith.constant 0 : index
    %17 = vector.load %arg5[%c0_11, %c0_12] : memref<8x256xf32, #tpu.memory_space<vmem>>, vector<8x256xf32>
    tpu.vector_store %arg5[%c0_11, %c0_12], %16 {strides = array<i32>} : memref<8x256xf32, #tpu.memory_space<vmem>>, vector<8x256xf32>,
    %c2_i32 = arith.constant 2 : i32
    %18 = arith.addi %1, %c2_i32 : i32
    %c0_13 = arith.constant 0 : index
    %19 = arith.index_cast %18 : i32 to index
    %c0_14 = arith.constant 0 : index
    %20 = vector.load %arg2[%c0_13, %19, %c0_14] : memref<1x12x16xf32, #tpu.memory_space<vmem>>, vector<1x8x16xf32>
    %21 = vector.shape_cast %20 : vector<1x8x16xf32> to vector<8x16xf32>
    %c32 = arith.constant 32 : index
    %c0_15 = arith.constant 0 : index
    %22 = vector.load %arg3[%c32, %c0_15] : memref<80x256xf32, #tpu.memory_space<vmem>>, vector<16x256xf32>
    %cst_16 = arith.constant dense<0.000000e+00> : vector<8x256xf32>
    %23 = tpu.matmul %21, %22, %cst_16 {dimension_numbers = #tpu.dot_dimension_numbers<[1], [0], [0], [1], [0, 0, 1, 1], [], []>} : vector<8x16xf32>, vector<16x256xf32>, vector<8x256xf32> -> vector<8x256xf32>
    %c0_17 = arith.constant 0 : index
    %c0_18 = arith.constant 0 : index
    %24 = vector.load %arg5[%c0_17, %c0_18] : memref<8x256xf32, #tpu.memory_space<vmem>>, vector<8x256xf32>
    %25 = arith.addf %24, %23 : vector<8x256xf32>
    %c0_19 = arith.constant 0 : index
    %c0_20 = arith.constant 0 : index
    %26 = vector.load %arg5[%c0_19, %c0_20] : memref<8x256xf32, #tpu.memory_space<vmem>>, vector<8x256xf32>
    tpu.vector_store %arg5[%c0_19, %c0_20], %25 {strides = array<i32>} : memref<8x256xf32, #tpu.memory_space<vmem>>, vector<8x256xf32>,
    %c3_i32 = arith.constant 3 : i32
    %27 = arith.addi %1, %c3_i32 : i32
    %c0_21 = arith.constant 0 : index
    %28 = arith.index_cast %27 : i32 to index
    %c0_22 = arith.constant 0 : index
    %29 = vector.load %arg2[%c0_21, %28, %c0_22] : memref<1x12x16xf32, #tpu.memory_space<vmem>>, vector<1x8x16xf32>
    %30 = vector.shape_cast %29 : vector<1x8x16xf32> to vector<8x16xf32>
    %c48 = arith.constant 48 : index
    %c0_23 = arith.constant 0 : index
    %31 = vector.load %arg3[%c48, %c0_23] : memref<80x256xf32, #tpu.memory_space<vmem>>, vector<16x256xf32>
    %cst_24 = arith.constant dense<0.000000e+00> : vector<8x256xf32>
    %32 = tpu.matmul %30, %31, %cst_24 {dimension_numbers = #tpu.dot_dimension_numbers<[1], [0], [0], [1], [0, 0, 1, 1], [], []>} : vector<8x16xf32>, vector<16x256xf32>, vector<8x256xf32> -> vector<8x256xf32>
    %c0_25 = arith.constant 0 : index
    %c0_26 = arith.constant 0 : index
    %33 = vector.load %arg5[%c0_25, %c0_26] : memref<8x256xf32, #tpu.memory_space<vmem>>, vector<8x256xf32>
    %34 = arith.addf %33, %32 : vector<8x256xf32>
    %c0_27 = arith.constant 0 : index
    %c0_28 = arith.constant 0 : index
    %35 = vector.load %arg5[%c0_27, %c0_28] : memref<8x256xf32, #tpu.memory_space<vmem>>, vector<8x256xf32>
    tpu.vector_store %arg5[%c0_27, %c0_28], %34 {strides = array<i32>} : memref<8x256xf32, #tpu.memory_space<vmem>>, vector<8x256xf32>,
    %c4_i32 = arith.constant 4 : i32
    %36 = arith.addi %1, %c4_i32 : i32
    %c0_29 = arith.constant 0 : index
    %37 = arith.index_cast %36 : i32 to index
    %c0_30 = arith.constant 0 : index
    %38 = vector.load %arg2[%c0_29, %37, %c0_30] : memref<1x12x16xf32, #tpu.memory_space<vmem>>, vector<1x8x16xf32>
    %39 = vector.shape_cast %38 : vector<1x8x16xf32> to vector<8x16xf32>
    %c64 = arith.constant 64 : index
    %c0_31 = arith.constant 0 : index
    %40 = vector.load %arg3[%c64, %c0_31] : memref<80x256xf32, #tpu.memory_space<vmem>>, vector<16x256xf32>
    %cst_32 = arith.constant dense<0.000000e+00> : vector<8x256xf32>
    %41 = tpu.matmul %39, %40, %cst_32 {dimension_numbers = #tpu.dot_dimension_numbers<[1], [0], [0], [1], [0, 0, 1, 1], [], []>} : vector<8x16xf32>, vector<16x256xf32>, vector<8x256xf32> -> vector<8x256xf32>
    %c0_33 = arith.constant 0 : index
    %c0_34 = arith.constant 0 : index
    %42 = vector.load %arg5[%c0_33, %c0_34] : memref<8x256xf32, #tpu.memory_space<vmem>>, vector<8x256xf32>
    %43 = arith.addf %42, %41 : vector<8x256xf32>
    %c0_35 = arith.constant 0 : index
    %c0_36 = arith.constant 0 : index
    %44 = vector.load %arg5[%c0_35, %c0_36] : memref<8x256xf32, #tpu.memory_space<vmem>>, vector<8x256xf32>
    tpu.vector_store %arg5[%c0_35, %c0_36], %43 {strides = array<i32>} : memref<8x256xf32, #tpu.memory_space<vmem>>, vector<8x256xf32>,
    %c0_37 = arith.constant 0 : index
    %c0_38 = arith.constant 0 : index
    %45 = vector.load %arg5[%c0_37, %c0_38] : memref<8x256xf32, #tpu.memory_space<vmem>>, vector<8x256xf32>
    %c0_39 = arith.constant 0 : index
    %c0_40 = arith.constant 0 : index
    %c0_41 = arith.constant 0 : index
    %46 = vector.load %arg4[%c0_39, %c0_40, %c0_41] : memref<1x8x256xf32, #tpu.memory_space<vmem>>, vector<1x8x256xf32>
    %47 = vector.shape_cast %46 : vector<1x8x256xf32> to vector<8x256xf32>
    %48 = vector.shape_cast %45 : vector<8x256xf32> to vector<1x8x256xf32>
    tpu.vector_store %arg4[%c0_39, %c0_40, %c0_41], %48 {strides = array<i32>} : memref<1x8x256xf32, #tpu.memory_space<vmem>>, vector<1x8x256xf32>,
    return
  }
  func.func @transform_0(%arg0: i32, %arg1: i32) -> (i32, i32, i32) {
    %c0_i32 = arith.constant 0 : i32
    %c0_i32_0 = arith.constant 0 : i32
    %c0_i32_1 = arith.constant 0 : i32
    return %arg0, %c0_i32, %c0_i32_0 : i32, i32, i32
  }
  func.func @transform_1(%arg0: i32, %arg1: i32) -> (i32, i32) {
    %c0_i32 = arith.constant 0 : i32
    %c0_i32_0 = arith.constant 0 : i32
    %c0_i32_1 = arith.constant 0 : i32
    return %c0_i32, %c0_i32_0 : i32, i32
  }
  func.func @transform_2(%arg0: i32, %arg1: i32) -> (i32, i32, i32) {
    %c0_i32 = arith.constant 0 : i32
    %c0_i32_0 = arith.constant 0 : i32
    return %arg0, %arg1, %c0_i32 : i32, i32, i32
  }
}

</mosaic_0001>

<bundles_post_ra>
// kernel: tpu_custom_call.1
= control target key start
LH: loop header
LB: loop body
LE: loop exit
PB: predicated region body
PF: predicated region fallthrough
CT: control target
= control target key end

     0   :  { %7 = vsyncpa [#allocation4], 0  ;;  %s1137_s0 = inlined_call_operand.vmem [shape: f32[2,12,16], index: 0, kind: input, shape index: {}]   ;;  %s1138_s1 = inlined_call_operand.hbm [shape: f32[80,256], index: 1, kind: input, shape index: {}]   ;;  %s1139_s2 = inlined_call_operand.hbm [shape: f32[2,8,256], index: 2, kind: output, shape index: {}]  }
   0x1   :  { %8 = vsyncpa [#allocation5], 0 }
   0x2   :  { %10 = vsyncpa [#allocation5 + $0x1], 0  ;;  %s975_s9 = smov 0   ;;  %s977_s10 = smov 0  }
   0x3   :  { %s979_s11 = smov 0   ;;  %s981_s12 = smov 0  }
   0x4   :  { %s983_s13 = smov 0   ;;  %s985_s14 = smov 0  }
   0x5 LB: > { %s720_s15 = sadd.s32 4294967295, %s953_s14   ;;  %s721_s16 = sadd.s32 4294967294, %s953_s14   ;;  %s953_s14 = sphi %s985_s14, %s16_s14   ;;  %s949_s13 = sphi %s983_s13, %s1157_s13   ;;  %s945_s12 = sphi %s981_s12, %s1156_s12   ;;  %s941_s11 = sphi %s979_s11, %s1155_s11   ;;  %s937_s10 = sphi %s977_s10, %s1154_s10   ;;  %s933_s9 = sphi %s975_s9, %s1153_s9  }
   0x6   : > { %s28_s17 = sadd.s32 1, %s949_s13  ;;  %s84_s18 = sadd.s32 1, %s941_s11 }
   0x7   : > { %p30_p0 = scmp.ge.s32.totalorder %s28_s17, 2  ;;  %p94_p1 = scmp.ne.s32.totalorder %s941_s11, %s937_s10 }
   0x8   : > { %p95_p2 = scmp.eq.s32.totalorder %s720_s15, 1  ;;  %p100_p3 = scmp.ne.s32.totalorder %s937_s10, %s933_s9 }
   0x9   : > { %s1159_s17 = smov (%p30_p0, %s28_s17), 0  ;;  %p101_p5 = scmp.eq.s32.totalorder %s721_s16, 1 }
   0xa   : > { %p1015_p4 = por %p95_p2, %p94_p1  ;;  %s79_s20 = ssub.s32 %s949_s13, %s1159_s17 }
   0xb   : > { %p722_p6 = scmp.ge.s32.totalorder %s953_s14, 1  ;;  %p82_p7 = scmp.eq.s32.totalorder %s79_s20, 0 }
   0xc   : > { %s1144_s19 = scalar_select %p1015_p4, 1, 0 }
   0xd   : > { %p1022_p8 = por %p101_p5, %p100_p3  ;;  %p108_p9 = scmp.lt.s32.totalorder %s953_s14, 3 }
   0xe   : > { %s1028_s22 = scalar_select %p82_p7, %s941_s11, %s84_s18  }
   0xf   : > { %s1145_s21 = scalar_select %p1022_p8, 1, 0 }
  0x10   : > { %p1030_p10 = pnand %p722_p6, %p108_p9  ;;  %p1034_p11 = scmp.eq.s32.totalorder %s720_s15, 0 }
  0x11   : > { %s955_s25 = smov [#allocation3]   ;;  %s843_s30 = scalar_lea.hbm %s1138_s1, 2560 }
  0x12   : > { %s1146_s23 = scalar_select %p1030_p10, 1, 0 }
  0x13   : > { %s1147_s24 = scalar_select %p1034_p11, 1, 0 }
  0x14   : > { %p780_p12 = pneg %p1030_p10  ;;  %s120_s26 = sshll.u32 %s955_s25, 4  ;;  %s121_s26 = int_to_ptr.vmem [resolvable:$true] %s120_s26 }
  0x15   : > { %p844_p0 = scmp.ne.s32.totalorder %s1138_s1, %s843_s30  ;;  %p850_p5 = scmp.lt.u32.totalorder %s843_s30, %s1138_s1 }
  0x16   : > { %p1042_p13 = pnand %p1034_p11, %p780_p12 }
  0x18   : > { %p845_p1 = pneg %p1042_p13 }
  0x1a   : > { %p846_p2 = pnand %p845_p1, %p844_p0 }
  0x1c   : > { %p847_p3 = pneg %p846_p2 }
  0x1e   : > { %p852_p6 = pnand %p850_p5, %p847_p3 }
  0x20   : > { %855 = shalt.err (!%p852_p6)
}
  0x21   : > { %s856_s7 = scalar_lea.vmem %s121_s26, 2560  ;;  %p864_p8 = scmp.lt.s32.totalorder %s121_s26, %s121_s26 }
  0x22   : > { %p857_p7 = scmp.ne.s32.totalorder %s121_s26, %s856_s7  ;;  %p865_p4 = scmp.lt.s32.totalorder %s856_s7, %s856_s7 }
  0x24   : > { %p859_p9 = pnand %p857_p7, %p845_p1  ;;  %p866_p11 = por %p865_p4, %p864_p8 }
  0x26   : > { %p860_p12 = pneg %p859_p9 }
  0x28   : > { %p867_p10 = pnand %p866_p11, %p860_p12 }
  0x2a   : > { %870 = shalt.err (!%p867_p10)
}
  0x2b   : > { %s956_s8 = smov 256   ;;  %s957_s15 = smov 16  }
  0x2c   : > { %783 = dma.hbm_to_vmem [thread:$0]  (!%p1042_p13), %s1138_s1, 2560, %s121_s26, [#allocation4], %s956_s8, %s956_s8, %s957_s15  }
  0x2d   : > { %p1149_p0 = scmp.ne.s32.totalorder %s1146_s23, 0 }
  0x2e   : > { %p1150_p2 = scmp.ne.s32.totalorder (!%p1149_p0), %s1147_s24, 0 }
  0x2f   : > { %144 = sbr.rel (%p1149_p0) target bundleno = 309 (0x135), region = 28 }
  0x36   : > { %924 = dma.done.wait (%p1150_p2), [#allocation4], 2560  }
  0x37   : > { %926 = vsyncadd (%p1150_p2), [#allocation4], 4294964736  ;;  %p166_p4 = scmp.lt.s32.totalorder %s945_s12, 1  ;;  %v958_v0 = vmov 0.0   ;;  %v175_v1 = vld [vmem:[#allocation3 + $0x8] sm:$0xff]  ;;  %v177_v2 = vld [vmem:[#allocation3 + $0x18] sm:$0xff] }
  0x38   : > { %246 = vmatprep.mubr.f32.mxu1 %v958_v0  ;;  %416 = vmatprep.mubr.f32.mxu0 %v958_v0  ;;  %v346_v3 = vld [vmem:[#allocation3 + $0x48] sm:$0xff]  ;;  %v746_v4 = vpack.c.bf16 %v177_v2, %v175_v1  ;;  %v348_v5 = vld [vmem:[#allocation3 + $0x58] sm:$0xff]  ;;  %v174_v6 = vld [vmem:[#allocation3] sm:$0xff]  ;;  %vm178_vm0 = vcmask 130048   ;;  %s163_s23 = sand.u32 1, %s937_s10   ;;  %s745_s29 = sshll.u32 %s945_s12, 8 }
  0x39   : > { %s167_s20 = scalar_select %p166_p4, %s945_s12, 1  ;;  %v176_v7 = vld [vmem:[#allocation3 + $0x10] sm:$0xff]  ;;  %v754_v8 = vpack.c.bf16 %v348_v5, %v346_v3  ;;  %v345_v10 = vld [vmem:[#allocation3 + $0x40] sm:$0xff]  ;;  %v433_v15 = vld [vmem:[#allocation3 + $0x68] sm:$0xff] }
  0x3a   : > { %v748_v9 = vpack.c.bf16 %v176_v7, %v174_v6  ;;  %v347_v11 = vld [vmem:[#allocation3 + $0x50] sm:$0xff]  ;;  %747 = vmatprep.subr.bf16.mxu1 %v746_v4  ;;  %v435_v16 = vld [vmem:[#allocation3 + $0x78] sm:$0xff]  ;;  %v432_v18 = vld [vmem:[#allocation3 + $0x60] sm:$0xff]  ;;  %s727_s24 = sshll.u32 %s163_s23, 4  ;;  %s1090_s6 = scalar_lea.hbm %s1139_s2, %s745_s29 }
  0x3b   : > { %s744_s25 = sshll.u32 %s167_s20, 4  ;;  %v756_v13 = vpack.c.bf16 %v347_v11, %v345_v10  ;;  %755 = vmatprep.subr.bf16.mxu0 %v754_v8  ;;  %v758_v17 = vpack.c.bf16 %v435_v16, %v433_v15  ;;  %v434_v19 = vld [vmem:[#allocation3 + $0x70] sm:$0xff]  ;;  %v259_v20 = vld [vmem:[#allocation3 + $0x28] sm:$0xff]  ;;  %v261_v22 = vld [vmem:[#allocation3 + $0x38] sm:$0xff]  ;;  %s165_s30 = scalar_lea.vmem [#allocation6], %s727_s24 }
  0x3c   : > { %s1073_s26 = scalar_lea.vmem %s1137_s0, %s744_s25  ;;  %749 = vmatpush1.bf16.msra.mxu1 %v748_v9  ;;  %v760_v21 = vpack.c.bf16 %v434_v19, %v432_v18  ;;  %v258_v23 = vld [vmem:[#allocation3 + $0x20] sm:$0xff]  ;;  %v260_v24 = vld [vmem:[#allocation3 + $0x30] sm:$0xff]  ;;  %v750_v25 = vpack.c.bf16 %v261_v22, %v259_v20  ;;  %v520_v27 = vld [vmem:[#allocation3 + $0x88] sm:$0xff]  ;;  %s624_s3 = sshll.u32 %s165_s30, 4  ;;  %s1092_s3 = int_to_ptr.vmem [resolvable:$true] %s624_s3 }
  0x3d   : > { %v173_v12 = vld [vmem:[%s1073_s26] sm:$0xff]  ;;  %757 = vmatpush1.bf16.msra.mxu0 %v756_v13  ;;  %v752_v26 = vpack.c.bf16 %v260_v24, %v258_v23  ;;  %v522_v28 = vld [vmem:[#allocation3 + $0x98] sm:$0xff]  ;;  %v521_v31 = vld [vmem:[#allocation3 + $0x90] sm:$0xff]  ;;  %s608_s7 = scalar_lea.sflag [#allocation5], %s163_s23  ;;  %s871_s12 = scalar_lea.vmem %s1092_s3, 256 }
  0x3e   : > { %v733_v14 = vld [vmem:[%s1073_s26 + $0x2] sm:$0xff]  ;;  %759 = vmatprep.subr.bf16.mxu0 %v758_v17  ;;  %751 = vmatprep.subr.bf16.mxu1 %v750_v25  ;;  %v762_v29 = vpack.c.bf16 %v522_v28, %v520_v27  ;;  %p872_p8 = scmp.ne.s32.totalorder %s1092_s3, %s871_s12  ;;  %p1151_p10 = scmp.ne.s32.totalorder %s1144_s19, 0 }
  0x3f   : > { %730 = vmatmul.mubr.msk.f32.vlgmr.msra.gmra.mrb[0].mxu1 %vm178_vm0, %v173_v12  ;;  %v519_v30 = vld [vmem:[#allocation3 + $0x80] sm:$0xff]  ;;  %s959_s8 = smov [#allocation6]  }
  0x40   : > { %734 = vmatmul.mubr.msk.f32.vlgmr.msra.gmra.mrb[0].mxu0 %vm178_vm0, %v733_v14  ;;  %753 = vmatpush1.bf16.msra.mxu1 %v752_v26  ;;  %v731_v32 = vld [vmem:[%s1073_s26 + $0x1] sm:$0xff]  ;;  %v764_v34 = vpack.c.bf16 %v521_v31, %v519_v30  ;;  %p873_p11 = pnand %p872_p8, %p1151_p10  ;;  %s875_s15 = sshll.u32 %s959_s8, 4  ;;  %s876_s15 = int_to_ptr.vmem [resolvable:$false] %s875_s15 }
  0x41   : > { %761 = vmatpush1.bf16.msra.mxu0 %v760_v21  ;;  %329 = vmatprep.mubr.f32.mxu1 %v958_v0  ;;  %v735_v33 = vld [vmem:[%s1073_s26 + $0x3] sm:$0xff]  ;;  %s877_s16 = scalar_lea.vmem %s876_s15, 512  ;;  %p878_p1 = scmp.lt.s32.totalorder %s1092_s3, %s876_s15 }
  0x42   : > { %503 = vmatprep.mubr.f32.mxu0 %v958_v0  ;;  %763 = vmatprep.subr.bf16.mxu0 %v762_v29  ;;  %v737_v35 = vld [vmem:[%s1073_s26 + $0x4] sm:$0xff]  ;;  %p874_p13 = pneg %p873_p11  ;;  %p879_p3 = scmp.lt.s32.totalorder %s877_s16, %s871_s12 }
  0x44   : > { %p880_p5 = por %p879_p3, %p878_p1 }
  0x46   : > { %p881_p6 = pnand %p880_p5, %p874_p13 }
  0x47   : > { %732 = vmatmul.mubr.msk.f32.vlgmr.msra.gmra.mrb[0].mxu1 %vm178_vm0, %v731_v32 }
  0x48   : > { %736 = vmatmul.mubr.msk.f32.vlgmr.msra.gmra.mrb[0].mxu0 %vm178_vm0, %v735_v33 }
  0x49   : > { %765 = vmatpush1.bf16.msra.mxu0 %v764_v34  ;;  %590 = vmatprep.mubr.f32.mxu0 %v958_v0 }
  0x50   : > { %738 = vmatmul.mubr.msk.f32.vlgmr.msra.gmra.mrb[0].mxu0 %vm178_vm0, %v737_v35 }
 0x11a   : > { %v331_v36 = vpop.f32.mrb[0].mxu1 }
 0x11b   : > { %v333_v37 = vpop.f32.mrb[1].mxu1 }
 0x123   : > { %v592_v38 = vpop.f32.mrb[0].mxu0 }
 0x124   : > { %v766_v39 = vadd.f32 %v592_v38, %v331_v36  ;;  %v594_v40 = vpop.f32.mrb[1].mxu0 }
 0x125   : > { %v767_v41 = vadd.f32 %v594_v40, %v333_v37 }
 0x126   : > { %605 = vst [vmem:[%s165_s30] sm:$0xff] %v766_v39 }
 0x127   : > { %606 = vst [vmem:[%s165_s30 + $0x8] sm:$0xff] %v767_v41 }
 0x128   : > { %884 = shalt.err (!%p881_p6)
}
 0x129   : > { %s885_s18 = scalar_lea.hbm %s1090_s6, 256  ;;  %s889_s27 = scalar_lea.hbm %s1139_s2, 512 }
 0x12a   : > { %p886_p7 = scmp.ne.s32.totalorder %s1090_s6, %s885_s18  ;;  %p890_p0 = scmp.lt.u32.totalorder %s1090_s6, %s1139_s2 }
 0x12b   : > { %p891_p2 = scmp.lt.u32.totalorder %s889_s27, %s885_s18  ;;  %p893_p8 = scmp.lt.u32.totalorder %s885_s18, %s1090_s6 }
 0x12c   : > { %p887_p9 = pnand %p886_p7, %p1151_p10 }
 0x12d   : > { %p892_p4 = por %p891_p2, %p890_p0 }
 0x12e   : > { %p888_p12 = pneg %p887_p9 }
 0x12f   : > { %p894_p11 = por %p893_p8, %p892_p4 }
 0x131   : > { %p895_p13 = pnand %p894_p11, %p888_p12 }
 0x133   : > { %898 = shalt.err (!%p895_p13)
}
 0x134   : > { %778 = dma.vmem_to_hbm [thread:$0]  (%p1151_p10), %s1092_s3, 256, %s1090_s6, %s608_s7  }
 0x135 PF: > { %p790_p1 = scmp.ge.s32.totalorder %s953_s14, 2  ;;  %s636_s23 = sand.u32 1, %s933_s9  }
 0x136   : > { %p1152_p3 = scmp.ne.s32.totalorder %s1145_s21, 0  ;;  %s637_s24 = scalar_lea.sflag [#allocation5], %s636_s23 }
 0x138   : > { %p785_p5 = pnand %p790_p1, %p1152_p3 }
 0x13a   : > { %928 = dma.done.wait (!%p785_p5), %s637_s24, 256  }
 0x13b   : > { %930 = vsyncadd (!%p785_p5), %s637_s24, 4294967040  ;;  %s16_s14 = sadd.s32 1, %s953_s14   ;;  %s1153_s9 = smov %s937_s10 }
 0x13c   : > { %p13_p6 = scmp.ge.s32.totalorder %s16_s14, 4   ;;  %s1154_s10 = smov %s941_s11 }
 0x13d   : > { %s1155_s11 = smov %s1028_s22  ;;  %s1156_s12 = smov %s949_s13 }
 0x13e   : > { %s1157_s13 = smov %s1159_s17  ;;  %15 = sbr.rel (!%p13_p6) target bundleno = 5 (0x5), region = 73 }
 0x145   :  { %642 = vsyncpa [#allocation4], 1 }
 0x146   :  { %644 = vsyncpa [#allocation4 + $0x1], 1 }
 0x147   :  { %645 = vsyncpa [#allocation5], 1 }
 0x148   :  { %647 = vsyncpa [#allocation5 + $0x1], 1 }

</bundles_post_ra>
